<compile_context>
chip_gen: v7x
topology: tpu7x:2x2x1
jax: 0.10.0
libtpu: 0.0.40
codegen_flags: <defaults>
</compile_context>

<pallas_src>
import functools
import math

import jax
import jax.numpy as jnp
from jax.experimental import pallas as pl
from jax.experimental.pallas import tpu as pltpu

LOG_STD_MIN = -20.0
LOG_STD_MAX = 2.0
LANE = 128                      # vreg lane width on every TPU generation
OUT_LANES = 128                 # lane-dense output slab width
_HALF_LOG_2PI = 0.5 * math.log(2.0 * math.pi)
_LOG_2 = math.log(2.0)


def _actor_kernel(act_limit, obs_dim, act_dim, x_ref, w_ref, b_ref, out_ref):
    """Fused SquashedGaussianActor forward for one batch tile.

    x_ref   : (TB, HP)      bf16  lanes [0,obs_dim)=obs, [obs_dim,obs_dim+A)=eps, rest 0
    w_ref   : (L+1, HP, HP) bf16  hidden-layer weights + fused [mu|log_std] head (zero-padded)
    b_ref   : (L+1, 1, HP)  f32   matching biases (zero-padded)
    out_ref : (TB, 128)     f32   lanes [0,A)=action, lane A=logp, rest 0
    """
    x = x_ref[...]                                                   # bf16 (TB, HP)
    eps = x[:, obs_dim:obs_dim + act_dim].astype(jnp.float32)        # rsample eps
    num_hidden = w_ref.shape[0] - 1
    tb = x.shape[0]

    # --- self.net: (Linear -> ReLU) x L, output_activation == activation == ReLU ---
    h = x
    for layer in range(num_hidden):
        z = jnp.dot(h, w_ref[layer], preferred_element_type=jnp.float32) + b_ref[layer]
        h = jnp.maximum(z, 0.0).astype(jnp.bfloat16)

    # --- fused heads: lanes [0,A) = mu, [A,2A) = log_std ---
    heads = jnp.dot(h, w_ref[num_hidden], preferred_element_type=jnp.float32) + b_ref[num_hidden]
    mu = heads[:, :act_dim]
    log_std = jnp.clip(heads[:, act_dim:2 * act_dim], LOG_STD_MIN, LOG_STD_MAX)
    std = jnp.exp(log_std)

    # --- rsample: pi = mu + std * eps ---
    pi = mu + std * eps

    # --- Normal(mu, std).log_prob(pi):  (pi - mu) / std == eps exactly, no divide ---
    logp_elem = -0.5 * eps * eps - log_std - _HALF_LOG_2PI

    # --- tanh-squash correction: 2*(log 2 - pi - softplus(-2*pi)) ---
    t = -2.0 * pi
    softplus_t = jnp.maximum(t, 0.0) + jnp.log1p(jnp.exp(-jnp.abs(t)))
    corr = 2.0 * (_LOG_2 - pi - softplus_t)

    logp = jnp.sum(logp_elem - corr, axis=-1, keepdims=True)         # (TB, 1)
    act = act_limit * jnp.tanh(pi)                                   # (TB, A)

    # lane-dense output slab without concatenates: zero fill + two narrow slice stores
    out_ref[...] = jnp.zeros((tb, OUT_LANES), jnp.float32)
    out_ref[:, :act_dim] = act
    out_ref[:, act_dim:act_dim + 1] = logp


def pack_actor_params(params):
    """One-time packing of actor parameters (call when params change, NOT per forward).

    params = (w1, b1, w2, b2, ..., wmu, bmu, wls, bls) with weights stored (in, out).
    Returns (wstack bf16 (L+1, HP, HP), bstack f32 (L+1, 1, HP)).
    """
    *body, wmu, bmu, wls, bls = params
    layer_ws, layer_bs = list(body[0::2]), list(body[1::2])
    obs_dim = layer_ws[0].shape[0]
    act_dim = wmu.shape[1]

    ws = layer_ws + [jnp.concatenate([wmu, wls], axis=1)]            # fused [mu | log_std] head
    bs = layer_bs + [jnp.concatenate([bmu, bls], axis=1)]

    widest = max([w.shape[0] for w in ws] + [w.shape[1] for w in ws] + [obs_dim + act_dim])
    hp = -(-widest // LANE) * LANE                                   # pad width to lane multiple

    def pad_w(w):
        return jnp.zeros((hp, hp), jnp.float32).at[:w.shape[0], :w.shape[1]].set(w)

    def pad_b(b):
        return jnp.zeros((1, hp), jnp.float32).at[:, :b.shape[1]].set(b)

    wstack = jnp.stack([pad_w(w) for w in ws]).astype(jnp.bfloat16)  # (L+1, HP, HP) bf16
    bstack = jnp.stack([pad_b(b) for b in bs])                       # (L+1, 1, HP)  f32
    return wstack, bstack


def _pick_batch_tile(batch):
    """Batch tile: single block for tiny batches, else >=2 programs, cap 1024 rows."""
    if batch < 16:
        return batch                       # full-extent block (legal for any size)
    tb = min(-(-batch // 2), 1024)         # >= 2 grid programs (keeps v7x's 2nd TC busy)
    return -(-tb // 8) * 8                 # sublane-aligned


def squashed_gaussian_actor(obs, noise, wstack, bstack, act_limit):
    """Forward pass. Returns (pi_action (B, act_dim), logp_pi (B,))."""
    B, obs_dim = obs.shape
    act_dim = noise.shape[-1]
    hp = wstack.shape[-1]
    nl = wstack.shape[0]
    assert obs_dim + act_dim <= hp, "no free lanes to stash rsample noise"

    tb = _pick_batch_tile(B)
    n_blocks = -(-B // tb)                 # ceil-div: no B % TB restriction
    b_pad = n_blocks * tb

    # single lane-dense bf16 input slab: [ obs | eps | zeros ]; padded rows are zero
    slab = jnp.zeros((b_pad, hp), jnp.bfloat16)
    slab = slab.at[:B, :obs_dim].set(obs.astype(jnp.bfloat16))
    slab = slab.at[:B, obs_dim:obs_dim + act_dim].set(noise.astype(jnp.bfloat16))

    out = pl.pallas_call(
        functools.partial(_actor_kernel, float(act_limit), obs_dim, act_dim),
        out_shape=jax.ShapeDtypeStruct((b_pad, OUT_LANES), jnp.float32),
        grid_spec=pltpu.PrefetchScalarGridSpec(
            num_scalar_prefetch=0,
            grid=(n_blocks,),
            in_specs=[
                pl.BlockSpec((tb, hp), lambda i: (i, 0)),            # obs|eps slab (streamed)
                pl.BlockSpec((nl, hp, hp), lambda i: (0, 0, 0)),     # weight stack (resident)
                pl.BlockSpec((nl, 1, hp), lambda i: (0, 0, 0)),      # bias stack (resident)
            ],
            out_specs=pl.BlockSpec((tb, OUT_LANES), lambda i: (i, 0)),
        ),
        compiler_params=pltpu.CompilerParams(dimension_semantics=("parallel",)),
    )(slab, wstack, bstack)

    return out[:B, :act_dim], out[:B, act_dim]


def actor_reference(obs, params, noise, act_limit):
    """Pure-JAX (f32) reference mirroring the PyTorch forward()."""
    w1, b1, w2, b2, wmu, bmu, wls, bls = params
    h = jnp.maximum(obs @ w1 + b1, 0.0)
    h = jnp.maximum(h @ w2 + b2, 0.0)
    mu = h @ wmu + bmu
    log_std = jnp.clip(h @ wls + bls, LOG_STD_MIN, LOG_STD_MAX)
    std = jnp.exp(log_std)
    pi = mu + std * noise
    logp = jnp.sum(-0.5 * ((pi - mu) / std) ** 2 - log_std - 0.5 * jnp.log(2.0 * jnp.pi), axis=-1)
    logp -= jnp.sum(2.0 * (jnp.log(2.0) - pi - jax.nn.softplus(-2.0 * pi)), axis=-1)
    return act_limit * jnp.tanh(pi), logp


def init_params(key, obs_dim, hidden, act_dim):
    """Deterministic synthetic parameter init (weights stored (in, out))."""
    sizes = [obs_dim] + list(hidden)
    keys = jax.random.split(key, len(sizes) + 3)
    params = []
    for i in range(len(sizes) - 1):
        fan_in = sizes[i]
        w = jax.random.normal(keys[i], (sizes[i], sizes[i + 1]), jnp.float32) / jnp.sqrt(fan_in)
        b = jnp.zeros((1, sizes[i + 1]), jnp.float32)
        params += [w, b]
    wmu = jax.random.normal(keys[-3], (hidden[-1], act_dim), jnp.float32) / jnp.sqrt(hidden[-1])
    bmu = jnp.zeros((1, act_dim), jnp.float32)
    wls = jax.random.normal(keys[-2], (hidden[-1], act_dim), jnp.float32) / jnp.sqrt(hidden[-1])
    bls = jnp.zeros((1, act_dim), jnp.float32)
    return tuple(params) + (wmu, bmu, wls, bls)


if __name__ == "__main__":
    obs_dim, act_dim = 32, 8
    hidden = (64, 64)
    batch = 8
    act_limit = 2.0

    key = jax.random.PRNGKey(0)
    k_obs, k_noise, k_params = jax.random.split(key, 3)

    obs = jax.random.normal(k_obs, (batch, obs_dim), jnp.float32)
    noise = jax.random.normal(k_noise, (batch, act_dim), jnp.float32)  # rsample eps
    params = init_params(k_params, obs_dim, hidden, act_dim)

    # pack weights/biases ONCE (outside the per-step call path); reuse every forward
    wstack, bstack = pack_actor_params(params)

    pi_action, logp_pi = squashed_gaussian_actor(obs, noise, wstack, bstack, act_limit)
    jax.block_until_ready((pi_action, logp_pi))

    assert pi_action.shape == (batch, act_dim)
    assert logp_pi.shape == (batch,)
    assert bool(jnp.all(jnp.isfinite(pi_action))) and bool(jnp.all(jnp.isfinite(logp_pi)))
    assert bool(jnp.all(jnp.abs(pi_action) <= act_limit + 1e-5))

    # numeric check vs. an f32 pure-JAX reference of the PyTorch forward().
    # Tolerances account for bf16-streamed weights/activations (f32 accumulation).
    ref_act, ref_logp = actor_reference(obs, params, noise, act_limit)
    assert bool(jnp.allclose(pi_action, ref_act, atol=5e-2, rtol=5e-2))
    assert bool(jnp.allclose(logp_pi, ref_logp, atol=5e-2, rtol=5e-2))

    print("KERNEL_OK")
</pallas_src>

<mosaic_0001>
module attributes {stable_mosaic.version = 11 : i64} {
  func.func @_actor_kernel(%arg0: i32, %arg1: memref<8x128xbf16, #tpu.memory_space<vmem>>, %arg2: memref<3x128x128xbf16, #tpu.memory_space<vmem>>, %arg3: memref<3x1x128xf32, #tpu.memory_space<vmem>>, %arg4: memref<8x128xf32, #tpu.memory_space<vmem>>) attributes {dimension_semantics = [#tpu.dimension_semantics<parallel>], iteration_bounds = array<i64: 1>, scalar_prefetch = 0 : i64, scratch_operands = 0 : i64, tpu.core_type = #tpu.core_type<tc>, window_params = [{transform_indices = @transform_0, window_bounds = array<i64: 8, 128>}, {pipeline_mode = #tpu.pipeline_mode<synchronous>, transform_indices = @transform_1, window_bounds = array<i64: 3, 128, 128>}, {pipeline_mode = #tpu.pipeline_mode<synchronous>, transform_indices = @transform_2, window_bounds = array<i64: 3, 1, 128>}, {transform_indices = @transform_3, window_bounds = array<i64: 8, 128>}]} {
    %c0 = arith.constant 0 : index
    %c0_0 = arith.constant 0 : index
    %0 = vector.load %arg1[%c0, %c0_0] : memref<8x128xbf16, #tpu.memory_space<vmem>>, vector<8x128xbf16>
    %1 = vector.extract_strided_slice %0 {offsets = [0, 32], sizes = [8, 8], strides = [1, 1]} : vector<8x128xbf16> to vector<8x8xbf16>
    %2 = arith.extf %1 : vector<8x8xbf16> to vector<8x8xf32>
    %c0_1 = arith.constant 0 : index
    %c0_2 = arith.constant 0 : index
    %c0_3 = arith.constant 0 : index
    %3 = vector.load %arg2[%c0_1, %c0_2, %c0_3] : memref<3x128x128xbf16, #tpu.memory_space<vmem>>, vector<1x128x128xbf16>
    %4 = vector.shape_cast %3 : vector<1x128x128xbf16> to vector<128x128xbf16>
    %cst = arith.constant dense<0.000000e+00> : vector<8x128xf32>
    %5 = tpu.matmul %0, %4, %cst {dimension_numbers = #tpu.dot_dimension_numbers<[1], [0], [0], [1], [0, 0, 1, 1], [], []>} : vector<8x128xbf16>, vector<128x128xbf16>, vector<8x128xf32> -> vector<8x128xf32>
    %c0_4 = arith.constant 0 : index
    %c0_5 = arith.constant 0 : index
    %c0_6 = arith.constant 0 : index
    %6 = vector.load %arg3[%c0_4, %c0_5, %c0_6] : memref<3x1x128xf32, #tpu.memory_space<vmem>>, vector<1x1x128xf32>
    %7 = vector.shape_cast %6 : vector<1x1x128xf32> to vector<1x128xf32>
    %8 = vector.broadcast %7 : vector<1x128xf32> to vector<8x128xf32>
    %9 = arith.addf %5, %8 : vector<8x128xf32>
    %cst_7 = arith.constant 0.000000e+00 : f32
    %10 = vector.broadcast %cst_7 : f32 to vector<8x128xf32>
    %11 = arith.maximumf %9, %10 : vector<8x128xf32>
    %12 = arith.truncf %11 : vector<8x128xf32> to vector<8x128xbf16>
    %c1 = arith.constant 1 : index
    %c0_8 = arith.constant 0 : index
    %c0_9 = arith.constant 0 : index
    %13 = vector.load %arg2[%c1, %c0_8, %c0_9] : memref<3x128x128xbf16, #tpu.memory_space<vmem>>, vector<1x128x128xbf16>
    %14 = vector.shape_cast %13 : vector<1x128x128xbf16> to vector<128x128xbf16>
    %cst_10 = arith.constant dense<0.000000e+00> : vector<8x128xf32>
    %15 = tpu.matmul %12, %14, %cst_10 {dimension_numbers = #tpu.dot_dimension_numbers<[1], [0], [0], [1], [0, 0, 1, 1], [], []>} : vector<8x128xbf16>, vector<128x128xbf16>, vector<8x128xf32> -> vector<8x128xf32>
    %c1_11 = arith.constant 1 : index
    %c0_12 = arith.constant 0 : index
    %c0_13 = arith.constant 0 : index
    %16 = vector.load %arg3[%c1_11, %c0_12, %c0_13] : memref<3x1x128xf32, #tpu.memory_space<vmem>>, vector<1x1x128xf32>
    %17 = vector.shape_cast %16 : vector<1x1x128xf32> to vector<1x128xf32>
    %18 = vector.broadcast %17 : vector<1x128xf32> to vector<8x128xf32>
    %19 = arith.addf %15, %18 : vector<8x128xf32>
    %cst_14 = arith.constant 0.000000e+00 : f32
    %20 = vector.broadcast %cst_14 : f32 to vector<8x128xf32>
    %21 = arith.maximumf %19, %20 : vector<8x128xf32>
    %22 = arith.truncf %21 : vector<8x128xf32> to vector<8x128xbf16>
    %c2 = arith.constant 2 : index
    %c0_15 = arith.constant 0 : index
    %c0_16 = arith.constant 0 : index
    %23 = vector.load %arg2[%c2, %c0_15, %c0_16] : memref<3x128x128xbf16, #tpu.memory_space<vmem>>, vector<1x128x128xbf16>
    %24 = vector.shape_cast %23 : vector<1x128x128xbf16> to vector<128x128xbf16>
    %cst_17 = arith.constant dense<0.000000e+00> : vector<8x128xf32>
    %25 = tpu.matmul %22, %24, %cst_17 {dimension_numbers = #tpu.dot_dimension_numbers<[1], [0], [0], [1], [0, 0, 1, 1], [], []>} : vector<8x128xbf16>, vector<128x128xbf16>, vector<8x128xf32> -> vector<8x128xf32>
    %c2_18 = arith.constant 2 : index
    %c0_19 = arith.constant 0 : index
    %c0_20 = arith.constant 0 : index
    %26 = vector.load %arg3[%c2_18, %c0_19, %c0_20] : memref<3x1x128xf32, #tpu.memory_space<vmem>>, vector<1x1x128xf32>
    %27 = vector.shape_cast %26 : vector<1x1x128xf32> to vector<1x128xf32>
    %28 = vector.broadcast %27 : vector<1x128xf32> to vector<8x128xf32>
    %29 = arith.addf %25, %28 : vector<8x128xf32>
    %30 = vector.extract_strided_slice %29 {offsets = [0, 0], sizes = [8, 8], strides = [1, 1]} : vector<8x128xf32> to vector<8x8xf32>
    %31 = vector.extract_strided_slice %29 {offsets = [0, 8], sizes = [8, 8], strides = [1, 1]} : vector<8x128xf32> to vector<8x8xf32>
    %cst_21 = arith.constant -2.000000e+01 : f32
    %cst_22 = arith.constant 2.000000e+00 : f32
    %32 = vector.broadcast %cst_21 : f32 to vector<8x8xf32>
    %33 = arith.maximumf %32, %31 : vector<8x8xf32>
    %34 = vector.broadcast %cst_22 : f32 to vector<8x8xf32>
    %35 = arith.minimumf %34, %33 : vector<8x8xf32>
    %36 = math.exp %35 : vector<8x8xf32>
    %37 = arith.mulf %36, %2 : vector<8x8xf32>
    %38 = arith.addf %30, %37 : vector<8x8xf32>
    %cst_23 = arith.constant -5.000000e-01 : f32
    %39 = vector.broadcast %cst_23 : f32 to vector<8x8xf32>
    %40 = arith.mulf %39, %2 : vector<8x8xf32>
    %41 = arith.mulf %40, %2 : vector<8x8xf32>
    %42 = arith.subf %41, %35 : vector<8x8xf32>
    %cst_24 = arith.constant 0.918938517 : f32
    %43 = vector.broadcast %cst_24 : f32 to vector<8x8xf32>
    %44 = arith.subf %42, %43 : vector<8x8xf32>
    %cst_25 = arith.constant -2.000000e+00 : f32
    %45 = vector.broadcast %cst_25 : f32 to vector<8x8xf32>
    %46 = arith.mulf %45, %38 : vector<8x8xf32>
    %cst_26 = arith.constant 0.000000e+00 : f32
    %47 = vector.broadcast %cst_26 : f32 to vector<8x8xf32>
    %48 = arith.maximumf %46, %47 : vector<8x8xf32>
    %49 = math.absf %46 : vector<8x8xf32>
    %cst_27 = arith.constant 0.000000e+00 : f32
    %50 = vector.broadcast %cst_27 : f32 to vector<8x8xf32>
    %51 = arith.subf %50, %49 : vector<8x8xf32>
    %52 = math.exp %51 : vector<8x8xf32>
    %53 = math.log1p %52 : vector<8x8xf32>
    %54 = arith.addf %48, %53 : vector<8x8xf32>
    %cst_28 = arith.constant 0.693147182 : f32
    %55 = vector.broadcast %cst_28 : f32 to vector<8x8xf32>
    %56 = arith.subf %55, %38 : vector<8x8xf32>
    %57 = arith.subf %56, %54 : vector<8x8xf32>
    %cst_29 = arith.constant 2.000000e+00 : f32
    %58 = vector.broadcast %cst_29 : f32 to vector<8x8xf32>
    %59 = arith.mulf %58, %57 : vector<8x8xf32>
    %60 = arith.subf %44, %59 : vector<8x8xf32>
    %cst_30 = arith.constant dense<0.000000e+00> : vector<8xf32>
    %61 = vector.multi_reduction <add>, %60, %cst_30 [1] : vector<8x8xf32> to vector<8xf32>
    %62 = vector.shape_cast %61 : vector<8xf32> to vector<8x1xf32>
    %63 = math.tanh %38 : vector<8x8xf32>
    %cst_31 = arith.constant 2.000000e+00 : f32
    %64 = vector.broadcast %cst_31 : f32 to vector<8x8xf32>
    %65 = arith.mulf %64, %63 : vector<8x8xf32>
    %cst_32 = arith.constant 0.000000e+00 : f32
    %66 = vector.broadcast %cst_32 : f32 to vector<8x128xf32>
    %c0_33 = arith.constant 0 : index
    %c0_34 = arith.constant 0 : index
    %67 = vector.load %arg4[%c0_33, %c0_34] : memref<8x128xf32, #tpu.memory_space<vmem>>, vector<8x128xf32>
    tpu.vector_store %arg4[%c0_33, %c0_34], %66 {strides = array<i32>} : memref<8x128xf32, #tpu.memory_space<vmem>>, vector<8x128xf32>,
    %c0_35 = arith.constant 0 : index
    %c0_36 = arith.constant 0 : index
    %68 = vector.load %arg4[%c0_35, %c0_36] : memref<8x128xf32, #tpu.memory_space<vmem>>, vector<8x8xf32>
    tpu.vector_store %arg4[%c0_35, %c0_36], %65 {strides = array<i32>} : memref<8x128xf32, #tpu.memory_space<vmem>>, vector<8x8xf32>,
    %c0_37 = arith.constant 0 : index
    %c8 = arith.constant 8 : index
    %69 = vector.load %arg4[%c0_37, %c8] : memref<8x128xf32, #tpu.memory_space<vmem>>, vector<8x1xf32>
    tpu.vector_store %arg4[%c0_37, %c8], %62 {strides = array<i32>} : memref<8x128xf32, #tpu.memory_space<vmem>>, vector<8x1xf32>,
    return
  }
  func.func @transform_0(%arg0: i32) -> (i32, i32) {
    %c0_i32 = arith.constant 0 : i32
    %c0_i32_0 = arith.constant 0 : i32
    return %arg0, %c0_i32 : i32, i32
  }
  func.func @transform_1(%arg0: i32) -> (i32, i32, i32) {
    %c0_i32 = arith.constant 0 : i32
    %c0_i32_0 = arith.constant 0 : i32
    %c0_i32_1 = arith.constant 0 : i32
    %c0_i32_2 = arith.constant 0 : i32
    return %c0_i32, %c0_i32_0, %c0_i32_1 : i32, i32, i32
  }
  func.func @transform_2(%arg0: i32) -> (i32, i32, i32) {
    %c0_i32 = arith.constant 0 : i32
    %c0_i32_0 = arith.constant 0 : i32
    %c0_i32_1 = arith.constant 0 : i32
    %c0_i32_2 = arith.constant 0 : i32
    return %c0_i32, %c0_i32_0, %c0_i32_1 : i32, i32, i32
  }
  func.func @transform_3(%arg0: i32) -> (i32, i32) {
    %c0_i32 = arith.constant 0 : i32
    %c0_i32_0 = arith.constant 0 : i32
    return %arg0, %c0_i32 : i32, i32
  }
}

</mosaic_0001>

<bundles_post_ra>
// kernel: tpu_custom_call.1
= control target key start
LH: loop header
LB: loop body
LE: loop exit
PB: predicated region body
PF: predicated region fallthrough
CT: control target
= control target key end

     0   :  { %8 = vsyncpa [#allocation3], 0  ;;  %s811_s0 = inlined_call_operand.hbm [shape: bf16[8,128], index: 0, kind: input, shape index: {}]   ;;  %s812_s1 = inlined_call_operand.hbm [shape: bf16[3,128,128], index: 1, kind: input, shape index: {}]   ;;  %s813_s2 = inlined_call_operand.vmem [shape: f32[3,1,128], index: 2, kind: input, shape index: {}]   ;;  %s814_s3 = inlined_call_operand.hbm [shape: f32[8,128], index: 3, kind: output, shape index: {}]  }
   0x1   :  { %9 = vsyncpa [#allocation6], 0 }
   0x2   :  { %10 = vsyncpa [#allocation4], 0  ;;  %s694_s12 = smov [#allocation2]   ;;  %s695_s14 = smov [#allocation5]  }
   0x3   :  { %s17_s13 = sshll.u32 %s694_s12, 4  ;;  %s26_s15 = sshll.u32 %s695_s14, 4  ;;  %s18_s13 = int_to_ptr.vmem [resolvable:$true] %s17_s13  ;;  %s726_s15 = int_to_ptr.vmem [resolvable:$true] %s26_s15 }
   0x4   :  { %s622_s18 = scalar_lea.hbm %s811_s0, 64 }
   0x5   :  { %p623_p0 = scmp.ne.s32.totalorder %s811_s0, %s622_s18  ;;  %p626_p1 = scmp.lt.u32.totalorder %s622_s18, %s811_s0 }
   0x7   :  { %p628_p2 = pnand %p626_p1, %p623_p0 }
   0x9   :  { %631 = shalt.err (!%p628_p2)
}
   0xa   :  { %s632_s23 = scalar_lea.vmem %s18_s13, 64  ;;  %p637_p4 = scmp.lt.s32.totalorder %s18_s13, %s18_s13 }
   0xb   :  { %p633_p3 = scmp.ne.s32.totalorder %s18_s13, %s632_s23  ;;  %p638_p5 = scmp.lt.s32.totalorder %s632_s23, %s632_s23 }
   0xd   :  { %p639_p6 = por %p638_p5, %p637_p4 }
   0xf   :  { %p640_p7 = pnand %p639_p6, %p633_p3 }
  0x11   :  { %643 = shalt.err (!%p640_p7)
}
  0x12   :  { %20 = dma.hbm_to_vmem [thread:$0]  %s811_s0, 64, %s18_s13, [#allocation3]  }
  0x13   :  { %s644_s28 = scalar_lea.hbm %s812_s1, 3072 }
  0x14   :  { %p645_p8 = scmp.ne.s32.totalorder %s812_s1, %s644_s28  ;;  %p648_p9 = scmp.lt.u32.totalorder %s644_s28, %s812_s1 }
  0x16   :  { %p650_p10 = pnand %p648_p9, %p645_p8 }
  0x18   :  { %653 = shalt.err (!%p650_p10)
}
  0x19   :  { %s654_s6 = scalar_lea.vmem %s726_s15, 3072  ;;  %p659_p12 = scmp.lt.s32.totalorder %s726_s15, %s726_s15 }
  0x1a   :  { %p655_p11 = scmp.ne.s32.totalorder %s726_s15, %s654_s6  ;;  %p660_p13 = scmp.lt.s32.totalorder %s654_s6, %s654_s6 }
  0x1c   :  { %p661_p0 = por %p660_p13, %p659_p12 }
  0x1e   :  { %p662_p1 = pnand %p661_p0, %p655_p11 }
  0x20   :  { %665 = shalt.err (!%p662_p1)
}
  0x21   :  { %s696_s0 = smov 64   ;;  %s697_s7 = smov 4  }
  0x22   :  { %32 = dma.hbm_to_vmem [thread:$0]  %s812_s1, 3072, %s726_s15, [#allocation6], %s696_s0, %s696_s0, %s697_s7  }
  0x23   :  { %688 = dma.done.wait [#allocation3], 64  }
  0x24   :  { %689 = vsyncadd [#allocation3], 4294967232 }
  0x25   :  { %690 = dma.done.wait [#allocation6], 3072  }
  0x26   :  { %691 = vsyncadd [#allocation6], 4294964224  ;;  %v698_v0 = vmov 0.0   ;;  %vm699_vm0 = vmmov 0   ;;  %v590_v1 = vld [vmem:[#allocation5] sm:$0xff]   ;;  %v591_v2 = vld [vmem:[#allocation5 + $0x8] sm:$0xff]  }
  0x27   :  { %518 = vmatprep.subr.bf16.mxu0 %v698_v0  ;;  %441 = vst [vmem:[#allocation7] sm:$0xff] %v698_v0  ;;  %534 = vmatprep.mubr.msk.bf16.mxu0 %vm699_vm0, %v698_v0  ;;  %v592_v3 = vld [vmem:[#allocation5 + $0x10] sm:$0xff]   ;;  %v598_v4 = vld [vmem:[#allocation5 + $0x40] sm:$0xff]   ;;  %v593_v5 = vld [vmem:[#allocation5 + $0x18] sm:$0xff]   ;;  %s700_s11 = smov 104   ;;  %s701_s16 = smov 24  }
  0x28   :  { %538 = vmatprep.subr.bf16.mxu1 %v698_v0  ;;  %554 = vmatprep.mubr.msk.bf16.mxu1 %vm699_vm0, %v698_v0  ;;  %v599_v6 = vld [vmem:[#allocation5 + $0x48] sm:$0xff]   ;;  %v594_v7 = vld [vmem:[#allocation5 + $0x20] sm:$0xff]   ;;  %v600_v8 = vld [vmem:[#allocation5 + $0x50] sm:$0xff]   ;;  %s702_s17 = smov 120   ;;  %vm435_vm1 = vcmask 64512   ;;  %s704_s18 = smov 96  }
  0x29   :  { %519 = vmatpush3.bf16.msra.mxu0 %v590_v1  ;;  %539 = vmatpush3.bf16.msra.mxu1 %v598_v4  ;;  %v595_v9 = vld [vmem:[#allocation5 + $0x28] sm:$0xff]   ;;  %v601_v10 = vld [vmem:[#allocation5 + $0x58] sm:$0xff]   ;;  %v596_v11 = vld [vmem:[#allocation5 + $0x30] sm:$0xff]   ;;  %s705_s19 = smov [#allocation7]   ;;  %vm443_vm3 = vcmask 72768  }
  0x2a   :  { %520 = vmatprep.subr.bf16.mxu0 %v698_v0  ;;  %540 = vmatprep.subr.bf16.mxu1 %v698_v0  ;;  %v602_v12 = vld [vmem:[#allocation5 + $0x60] sm:$0xff]   ;;  %v597_v13 = vld [vmem:[#allocation5 + $0x38] sm:$0xff]   ;;  %v603_v14 = vld [vmem:[#allocation5 + $0x68] sm:$0xff]   ;;  %s451_s20 = sshll.u32 %s705_s19, 4  ;;  %s452_s20 = int_to_ptr.vmem [resolvable:$true] %s451_s20 }
  0x2b   :  { %v42_v15 = vld [vmem:[#allocation2] sm:$0xf]  ;;  %v604_v16 = vld [vmem:[#allocation5 + $0x70] sm:$0xff]   ;;  %v606_v18 = vld [vmem:[#allocation5 + $0x80] sm:$0xff]   ;;  %s666_s21 = scalar_lea.vmem %s452_s20, 128  ;;  %p671_p3 = scmp.lt.s32.totalorder %s452_s20, %s452_s20 }
  0x2c   :  { %v605_v17 = vld [vmem:[#allocation5 + $0x78] sm:$0xff]   ;;  %v607_v19 = vld [vmem:[#allocation5 + $0x88] sm:$0xff]   ;;  %v608_v20 = vld [vmem:[#allocation5 + $0x90] sm:$0xff]   ;;  %v43_v34 = vunpack.c.l.bf16 %v42_v15  ;;  %p667_p2 = scmp.ne.s32.totalorder %s452_s20, %s666_s21  ;;  %p672_p4 = scmp.lt.s32.totalorder %s666_s21, %s666_s21 }
  0x2d   :  { %521 = vmatpush3.bf16.msra.mxu0 %v591_v2  ;;  %541 = vmatpush3.bf16.msra.mxu1 %v599_v6  ;;  %v609_v21 = vld [vmem:[#allocation5 + $0x98] sm:$0xff]   ;;  %v610_v22 = vld [vmem:[#allocation5 + $0xa0] sm:$0xff]   ;;  %v611_v23 = vld [vmem:[#allocation5 + $0xa8] sm:$0xff]  }
  0x2e   :  { %522 = vmatprep.subr.bf16.mxu0 %v698_v0  ;;  %542 = vmatprep.subr.bf16.mxu1 %v698_v0  ;;  %v461_v24 = vld [vmem:[%s813_s2] ss:$0 sm:$0xff]  ;;  %v612_v32 = vld [vmem:[#allocation5 + $0xb0] sm:$0xff]   ;;  %v471_v35 = vld [vmem:[%s813_s2 + $0x1] ss:$0 sm:$0xff]  ;;  %p673_p5 = por %p672_p4, %p671_p3 }
  0x2f   :  { %v613_v33 = vld [vmem:[#allocation5 + $0xb8] sm:$0xff]   ;;  %390 = vrot.lane.b32.xlu0 %v43_v34, %s700_s11 }
  0x30   :  { %v481_v43 = vld [vmem:[%s813_s2 + $0x2] ss:$0 sm:$0xff]  ;;  %s703_s2 = smov 32   ;;  %p674_p6 = pnand %p673_p5, %p667_p2 }
  0x31   :  { %523 = vmatpush3.bf16.msra.mxu0 %v592_v3  ;;  %543 = vmatpush3.bf16.msra.mxu1 %v600_v8 }
  0x32   :  { %524 = vmatprep.subr.bf16.mxu0 %v698_v0  ;;  %544 = vmatprep.subr.bf16.mxu1 %v698_v0 }
  0x35   :  { %525 = vmatpush3.bf16.msra.mxu0 %v593_v5  ;;  %545 = vmatpush3.bf16.msra.mxu1 %v601_v10 }
  0x36   :  { %526 = vmatprep.subr.bf16.mxu0 %v698_v0  ;;  %546 = vmatprep.subr.bf16.mxu1 %v698_v0 }
  0x39   :  { %527 = vmatpush3.bf16.msra.mxu0 %v594_v7  ;;  %547 = vmatpush3.bf16.msra.mxu1 %v602_v12 }
  0x3a   :  { %528 = vmatprep.subr.bf16.mxu0 %v698_v0  ;;  %548 = vmatprep.subr.bf16.mxu1 %v698_v0 }
  0x3d   :  { %529 = vmatpush3.bf16.msra.mxu0 %v595_v9  ;;  %549 = vmatpush3.bf16.msra.mxu1 %v603_v14 }
  0x3e   :  { %530 = vmatprep.subr.bf16.mxu0 %v698_v0  ;;  %550 = vmatprep.subr.bf16.mxu1 %v698_v0 }
  0x41   :  { %531 = vmatpush3.bf16.msra.mxu0 %v596_v11  ;;  %551 = vmatpush3.bf16.msra.mxu1 %v604_v16 }
  0x42   :  { %532 = vmatprep.subr.bf16.mxu0 %v698_v0  ;;  %552 = vmatprep.subr.bf16.mxu1 %v698_v0 }
  0x45   :  { %533 = vmatpush3.bf16.msra.mxu0 %v597_v13  ;;  %553 = vmatpush3.bf16.msra.mxu1 %v605_v17  ;;  %v399_v13 = vmul.f32 -0.5, %v43_v34 }
  0x46   :  { %558 = vmatprep.subr.bf16.mxu0 %v698_v0 }
  0x47   :  { %v400_v14 = vmul.f32 %v399_v13, %v43_v34 }
  0x48   :  { %535 = vmatmul.mubr.bf16.vlgmr.msra.gmra.mrb[0].mxu0 %v42_v15 }
  0x49   :  { %574 = vmatprep.mubr.msk.bf16.mxu0 %vm699_vm0, %v698_v0  ;;  %559 = vmatpush3.bf16.msra.mxu0 %v606_v18 }
  0x4a   :  { %560 = vmatprep.subr.bf16.mxu0 %v698_v0 }
  0x4d   :  { %561 = vmatpush3.bf16.msra.mxu0 %v607_v19 }
  0x4e   :  { %562 = vmatprep.subr.bf16.mxu0 %v698_v0 }
  0x51   :  { %563 = vmatpush3.bf16.msra.mxu0 %v608_v20 }
  0x52   :  { %564 = vmatprep.subr.bf16.mxu0 %v698_v0 }
  0x55   :  { %565 = vmatpush3.bf16.msra.mxu0 %v609_v21 }
  0x56   :  { %566 = vmatprep.subr.bf16.mxu0 %v698_v0 }
  0x59   :  { %567 = vmatpush3.bf16.msra.mxu0 %v610_v22 }
  0x5a   :  { %568 = vmatprep.subr.bf16.mxu0 %v698_v0 }
  0x5d   :  { %569 = vmatpush3.bf16.msra.mxu0 %v611_v23 }
  0x5e   :  { %570 = vmatprep.subr.bf16.mxu0 %v698_v0 }
  0x61   :  { %571 = vmatpush3.bf16.msra.mxu0 %v612_v32 }
  0x62   :  { %572 = vmatprep.subr.bf16.mxu0 %v698_v0 }
  0x65   :  { %573 = vmatpush3.bf16.msra.mxu0 %v613_v33 }
  0xa1   :  { %v391_v52 = vpop.permute.xlu0 %390 }
 0x11b   :  { %v149_v25 = vpop.f32.mrb[0].mxu0 }
 0x11c   :  { %v150_v26 = vadd.f32 %v461_v24, %v149_v25  ;;  %v536_v27 = vpop.f32.mrb[1].mxu0 }
 0x11d   :  { %v152_v28 = vpop.f32.mrb[2].mxu0 }
 0x11e   :  { %v155_v29 = vmax.f32 %v150_v26, 0.0  ;;  %v537_v30 = vpop.f32.mrb[3].mxu0 }
 0x120   :  { %v156_v31 = vpack.c.bf16 %v155_v29, %v155_v29 }
 0x122   :  { %555 = vmatmul.mubr.bf16.vlgmr.msra.gmra.mrb[0].mxu1 %v156_v31 }
 0x1f5   :  { %v264_v36 = vpop.f32.mrb[0].mxu1 }
 0x1f6   :  { %v265_v37 = vadd.f32 %v471_v35, %v264_v36  ;;  %v556_v38 = vpop.f32.mrb[1].mxu1 }
 0x1f7   :  { %v267_v39 = vpop.f32.mrb[2].mxu1 }
 0x1f8   :  { %v270_v40 = vmax.f32 %v265_v37, 0.0  ;;  %v557_v41 = vpop.f32.mrb[3].mxu1 }
 0x1fa   :  { %v271_v42 = vpack.c.bf16 %v270_v40, %v270_v40 }
 0x1fc   :  { %575 = vmatmul.mubr.bf16.vlgmr.msra.gmra.mrb[4].mxu0 %v271_v42 }
 0x2cf   :  { %v379_v44 = vpop.f32.mrb[4].mxu0 }
 0x2d0   :  { %v380_v45 = vadd.f32 %v481_v43, %v379_v44  ;;  %v576_v46 = vpop.f32.mrb[5].mxu0 }
 0x2d1   :  { %v382_v47 = vpop.f32.mrb[6].mxu0 }
 0x2d2   :  { %v577_v48 = vpop.f32.mrb[7].mxu0  ;;  %v385_v49 = vmax.f32 %v380_v45, -20.0 }
 0x2d4   :  { %v386_v50 = vmin.f32 %v385_v49, 2.0 }
 0x2d6   :  { %402 = vrot.lane.b32.xlu1 %v386_v50, %s701_s16  ;;  %v387_v51 = vmul.f32 1.442695, %v386_v50 }
 0x2d8   :  { %614 = vpow2.f32 %v387_v51 }
 0x2e2   :  { %v615_v53 = vpop.eup %614 }
 0x2e3   :  { %v393_v54 = vmul.f32 %v615_v53, %v391_v52 }
 0x2e5   :  { %395 = vrot.lane.b32.xlu0 %v393_v54, %s702_s17 }
 0x348   :  { %v403_v15 = vpop.permute.xlu1 %402 }
 0x349   :  { %v405_v16 = vsub.f32 %v400_v14, %v403_v15 }
 0x34b   :  { %v490_v17 = vadd.f32 -0.9189385, %v405_v16 }
 0x357   :  { %v396_v55 = vpop.permute.xlu0 %395 }
 0x358   :  { %v398_v56 = vadd.f32 %v396_v55, %v380_v45 }
 0x35a   :  { %v407_v57 = vmul.f32 -2.0, %v398_v56  ;;  %616 = vtanh.f32 %v398_v56  ;;  %v423_v9 = vsub.f32 0.6931472, %v398_v56 }
 0x35c   :  { %v409_v58 = vand.u32 2147483647, %v407_v57  ;;  %v408_v7 = vmax.f32 %v407_v57, 0.0 }
 0x35e   :  { %v410_v59 = vsub.f32 0.0, %v409_v58 }
 0x360   :  { %v411_v60 = vmul.f32 1.442695, %v410_v59 }
 0x362   :  { %618 = vpow2.f32 %v411_v60 }
 0x364   :  { %v617_v61 = vpop.eup %616 }
 0x365   :  { %v440_v62 = vmul.f32 2.0, %v617_v61 }
 0x367   :  { %442 = vst.msk [vmem:[#allocation7] sm:$0xff] %vm435_vm1, %v440_v62 }
 0x36c   :  { %v619_v63 = vpop.eup %618 }
 0x36d   :  { %v413_v0 = vadd.f32 1.0, %v619_v63  ;;  %v416_v1 = vmul.f32 -0.5, %v619_v63  ;;  %v419_v3 = vand.u32 2147483647, %v619_v63 }
 0x36f   :  { %620 = vlog2.f32 %v413_v0  ;;  %v417_v2 = vadd.f32 1.0, %v416_v1  ;;  %vm420_vm2 = vcmp.lt.f32.partialorder %v419_v3, 0.0004427343 }
 0x371   :  { %v418_v6 = vmul.f32 %v619_v63, %v417_v2 }
 0x379   :  { %v621_v4 = vpop.eup %620 }
 0x37a   :  { %v415_v5 = vmul.f32 0.6931472, %v621_v4 }
 0x37c   :  { %v421_v8 = vsel %vm420_vm2, %v418_v6, %v415_v5 }
 0x37d   :  { %v422_v10 = vadd.f32 %v421_v8, %v408_v7 }
 0x37f   :  { %v424_v11 = vsub.f32 %v423_v9, %v422_v10 }
 0x381   :  { %v425_v12 = vmul.f32 2.0, %v424_v11 }
 0x383   :  { %427 = vrot.lane.b32.xlu1 %v425_v12, %s703_s2 }
 0x3f5   :  { %v428_v18 = vpop.permute.xlu1 %427 }
 0x3f6   :  { %v430_v19 = vsub.f32 %v490_v17, %v428_v18 }
 0x3f8   :  { %432 = vrot.lane.b32.xlu0 %v430_v19, %s704_s18 }
 0x46a   :  { %v433_v20 = vpop.permute.xlu0 %432 }
 0x46b   :  { %v436_v21 = vsel %vm435_vm1, %v433_v20, 0.0 }
 0x46c   :  { %437 = vadd.xlane.f32.xlu1 %v436_v21 }
 0x4f9   :  { %v438_v22 = vpop.xlane.xlu1 %437 }
 0x4fa   :  { %444 = vst.msk [vmem:[#allocation7] sm:$0xff] %vm443_vm3, %v438_v22 }
 0x4fb   :  { %677 = shalt.err (!%p674_p6)
}
 0x4fc   :  { %s678_s24 = scalar_lea.hbm %s814_s3, 128 }
 0x4fd   :  { %p679_p7 = scmp.ne.s32.totalorder %s814_s3, %s678_s24  ;;  %p682_p8 = scmp.lt.u32.totalorder %s678_s24, %s814_s3 }
 0x4ff   :  { %p684_p9 = pnand %p682_p8, %p679_p7 }
 0x501   :  { %687 = shalt.err (!%p684_p9)
}
 0x502   :  { %454 = dma.vmem_to_hbm [thread:$0]  %s452_s20, 128, %s814_s3, [#allocation4]  }
 0x503   :  { %692 = dma.done.wait [#allocation4], 128  }
 0x504   :  { %693 = vsyncadd [#allocation4], 4294967168 }
 0x505   :  { %458 = vsyncpa [#allocation3], 1 }
 0x506   :  { %459 = vsyncpa [#allocation6], 1 }
 0x507   :  { %460 = vsyncpa [#allocation4], 1 }

</bundles_post_ra>
